<compile_context>
chip_gen: v6e
topology: v6e:2x2x1
jax: 0.10.0
libtpu: 0.0.40
codegen_flags: <defaults>
</compile_context>

<pallas_src>
import functools

import numpy as np
import jax
import jax.numpy as jnp
from jax import lax
from jax.experimental import pallas as pl
from jax.experimental.pallas import tpu as pltpu


def _pool_matrix(h, w, kh, kw, dtype):
    """(H*W, Ho*Wo) 0/1 matrix: column q selects the kh*kw inputs of window q."""
    ho, wo = h - kh + 1, w - kw + 1
    m = np.zeros((h * w, ho * wo), np.float32)
    cols = np.arange(ho * wo)
    oh = np.arange(ho)[:, None]
    ow = np.arange(wo)[None, :]
    for dh in range(kh):
        for dw in range(kw):
            rows = ((oh + dh) * w + (ow + dw)).ravel()
            m[rows, cols] = 1.0          # exact in bf16 (0 / 1 entries only)
    return jnp.asarray(m, dtype)


def _head_kernel(x_ref, w_ref, pm_ref, b_ref, o_ref, *, b_tile, inv_area, q_pos):
    # x_ref : (B_tile, C, H*W)  f32   one tile of batch elements
    # w_ref : (N, C)            f32   nn.Linear weight layout (out, in)
    # pm_ref: (H*W, Ho*Wo)      bf16  constant pooling matrix (0/1)
    # b_ref : (N, 1)            f32   bias
    # o_ref : (B_tile, N)       f32
    # Hoisted once per grid step (shared across the batch tile).
    w_bf = w_ref[...].astype(jnp.bfloat16)                       # (N, C)
    pm_bf = pm_ref[...]                                          # (P, Q)
    bias = b_ref[...]                                            # (N, 1)
    mean_row = jnp.full((1, q_pos), 1.0 / q_pos, jnp.float32)    # (1, Q)

    for b in range(b_tile):                                      # static unroll
        xb = x_ref[b].astype(jnp.bfloat16)                       # (C, P) -> MXU dtype
        # AvgPool (as window sums) on the MXU: (C, P) @ (P, Q) -> (C, Q)
        pooled = jnp.dot(xb, pm_bf, preferred_element_type=jnp.float32)
        # Projection on the MXU: (N, C) @ (C, Q) -> (N, Q)
        logits = jnp.dot(w_bf, pooled.astype(jnp.bfloat16),
                         preferred_element_type=jnp.float32)
        logits = logits * inv_area + bias                        # avg scale + bias (f32)

        # Softmax over classes (axis 0), numerically stable.
        m = jnp.max(logits, axis=0, keepdims=True)               # (1, Q)
        e = jnp.exp(logits - m)                                  # (N, Q)
        s = jnp.sum(e, axis=0, keepdims=True)                    # (1, Q)
        probs = e * pl.reciprocal(s, approx=True)                # (N, Q)

        # Mean over positions, produced directly in (1, N) lane-dense form:
        # (1, Q) . (N, Q)^T  via dot_general contracting the last dims.
        row = lax.dot_general(mean_row, probs, (((1,), (1,)), ((), ())),
                              preferred_element_type=jnp.float32)  # (1, N)
        o_ref[pl.ds(b, 1), :] = row.astype(o_ref.dtype)


def head_fullframe_c2d_1x1(feats, weight, bias, pool_hw):
    """feats: (B, C, 1, H, W); weight: (num_classes, C) [nn.Linear layout];
    bias: (num_classes,). Returns {'x_final': (B, num_classes)} (eval mode)."""
    B, C, T, H, W = feats.shape
    assert T == 1, "Head_fullframe_c2d_1x1 requires temporal dim == 1"
    kh, kw = pool_hw
    ho, wo = H - kh + 1, W - kw + 1
    P, Q = H * W, ho * wo
    N, C_w = weight.shape
    assert C_w == C

    # Free reshape (contiguous dims merged) -- no HBM transpose of the features.
    x = feats.reshape(B, C, P).astype(jnp.float32)
    bias2d = bias.reshape(N, 1).astype(jnp.float32)
    poolmat = _pool_matrix(H, W, kh, kw, jnp.bfloat16)

    # Batch tiling: as many elements per grid step as fit a VMEM budget (<=8).
    per_elem_bytes = C * P * 4
    max_bt = max(1, min(8, (40 << 20) // (2 * per_elem_bytes)))
    b_tile = 1
    for d in range(1, B + 1):
        if B % d == 0 and d <= max_bt:
            b_tile = d
    # TODO(synk): if a single (C, H*W) slab exceeds the VMEM budget (huge
    # feature maps on v7x's 64 MiB), add an H-tiling grid axis with kh-1 halo.

    vmem_needed = (2 * b_tile * per_elem_bytes      # double-buffered x blocks
                   + N * C * 4 + P * Q * 2 + N * 4  # resident weight / poolmat / bias
                   + 2 * b_tile * N * 4             # double-buffered output block
                   + (4 << 20))                     # headroom
    vmem_limit = int(min(64 << 20, max(16 << 20, vmem_needed)))

    kernel = functools.partial(_head_kernel, b_tile=b_tile,
                               inv_area=1.0 / float(kh * kw), q_pos=Q)
    out = pl.pallas_call(
        kernel,
        out_shape=jax.ShapeDtypeStruct((B, N), jnp.float32),
        grid=(B // b_tile,),
        in_specs=[
            pl.BlockSpec((b_tile, C, P), lambda i: (i, 0, 0)),
            pl.BlockSpec((N, C), lambda i: (0, 0)),
            pl.BlockSpec((P, Q), lambda i: (0, 0)),
            pl.BlockSpec((N, 1), lambda i: (0, 0)),
        ],
        out_specs=pl.BlockSpec((b_tile, N), lambda i: (i, 0)),
        compiler_params=pltpu.CompilerParams(
            dimension_semantics=("parallel",),
            vmem_limit_bytes=vmem_limit),
    )(x, weight.astype(jnp.float32), poolmat, bias2d)
    return {"x_final": out}


def _reference(feats, weight, bias, pool_hw):
    """Plain-JAX f32 reference mirroring the PyTorch forward (eval mode)."""
    B, C, T, H, W = feats.shape
    kh, kw = pool_hw
    ho, wo = H - kh + 1, W - kw + 1
    x = jnp.transpose(feats[:, :, 0, :, :], (0, 2, 3, 1))        # (B, H, W, C)
    acc = jnp.zeros((B, ho, wo, C), jnp.float32)
    for dh in range(kh):
        for dw in range(kw):
            acc = acc + x[:, dh:dh + ho, dw:dw + wo, :]
    pooled = acc / float(kh * kw)
    logits = jnp.einsum("bhwc,nc->bhwn", pooled, weight) + bias  # nn.Linear layout
    probs = jax.nn.softmax(logits, axis=-1)
    return probs.mean(axis=(1, 2))                               # (B, num_classes)


if __name__ == "__main__":
    # Small synthetic config consistent with the module:
    #   B=2 batch, C=32 channels (stand-in for WIDTH_PER_GROUP*32),
    #   T=1 frame, H=W=8 spatial, num_classes=16, pool kernel (1, 4, 4).
    B, C, T, H, W = 2, 32, 1, 8, 8
    num_classes = 16
    pool_hw = (4, 4)

    key = jax.random.PRNGKey(0)
    k_feat, k_w, k_b = jax.random.split(key, 3)
    feats = jax.random.normal(k_feat, (B, C, T, H, W), dtype=jnp.float32)
    weight = jax.random.normal(k_w, (num_classes, C), dtype=jnp.float32) * 0.05
    bias = jax.random.normal(k_b, (num_classes,), dtype=jnp.float32) * 0.01
    # NOTE: rt_dropout is identity in eval mode, so it is omitted in the kernel.

    result = head_fullframe_c2d_1x1(feats, weight, bias, pool_hw)
    x_final = jax.block_until_ready(result["x_final"])

    ref = _reference(feats, weight, bias, pool_hw)
    assert x_final.shape == (B, num_classes)
    # Tolerance accounts for bf16 MXU operands and approx EUP reciprocal.
    assert jnp.allclose(x_final, ref, atol=1e-3, rtol=1e-3), (
        "mismatch vs reference: max abs err = "
        f"{float(jnp.max(jnp.abs(x_final - ref)))}")

    print("KERNEL_OK")
</pallas_src>

<mosaic_0001>
module attributes {stable_mosaic.version = 11 : i64} {
  func.func @_head_kernel(%arg0: i32, %arg1: memref<2x32x64xf32, #tpu.memory_space<vmem>>, %arg2: memref<16x32xf32, #tpu.memory_space<vmem>>, %arg3: memref<64x25xbf16, #tpu.memory_space<vmem>>, %arg4: memref<16x1xf32, #tpu.memory_space<vmem>>, %arg5: memref<2x16xf32, #tpu.memory_space<vmem>>) attributes {dimension_semantics = [#tpu.dimension_semantics<parallel>], iteration_bounds = array<i64: 1>, scalar_prefetch = 0 : i64, scratch_operands = 0 : i64, tpu.core_type = #tpu.core_type<tc>, window_params = [{transform_indices = @transform_0, window_bounds = array<i64: 2, 32, 64>}, {pipeline_mode = #tpu.pipeline_mode<synchronous>, transform_indices = @transform_1, window_bounds = array<i64: 16, 32>}, {pipeline_mode = #tpu.pipeline_mode<synchronous>, transform_indices = @transform_2, window_bounds = array<i64: 64, 25>}, {pipeline_mode = #tpu.pipeline_mode<synchronous>, transform_indices = @transform_3, window_bounds = array<i64: 16, 1>}, {transform_indices = @transform_4, window_bounds = array<i64: 2, 16>}]} {
    %c0 = arith.constant 0 : index
    %c0_0 = arith.constant 0 : index
    %0 = vector.load %arg2[%c0, %c0_0] : memref<16x32xf32, #tpu.memory_space<vmem>>, vector<16x32xf32>
    %1 = arith.truncf %0 : vector<16x32xf32> to vector<16x32xbf16>
    %c0_1 = arith.constant 0 : index
    %c0_2 = arith.constant 0 : index
    %2 = vector.load %arg3[%c0_1, %c0_2] : memref<64x25xbf16, #tpu.memory_space<vmem>>, vector<64x25xbf16>
    %c0_3 = arith.constant 0 : index
    %c0_4 = arith.constant 0 : index
    %3 = vector.load %arg4[%c0_3, %c0_4] : memref<16x1xf32, #tpu.memory_space<vmem>>, vector<16x1xf32>
    %cst = arith.constant 4.000000e-02 : f32
    %4 = vector.broadcast %cst : f32 to vector<1x25xf32>
    %c0_5 = arith.constant 0 : index
    %c0_6 = arith.constant 0 : index
    %c0_7 = arith.constant 0 : index
    %5 = vector.load %arg1[%c0_5, %c0_6, %c0_7] : memref<2x32x64xf32, #tpu.memory_space<vmem>>, vector<1x32x64xf32>
    %6 = vector.shape_cast %5 : vector<1x32x64xf32> to vector<32x64xf32>
    %7 = arith.truncf %6 : vector<32x64xf32> to vector<32x64xbf16>
    %cst_8 = arith.constant dense<0.000000e+00> : vector<32x25xf32>
    %8 = tpu.matmul %7, %2, %cst_8 {dimension_numbers = #tpu.dot_dimension_numbers<[1], [0], [0], [1], [0, 0, 1, 1], [], []>} : vector<32x64xbf16>, vector<64x25xbf16>, vector<32x25xf32> -> vector<32x25xf32>
    %9 = arith.truncf %8 : vector<32x25xf32> to vector<32x25xbf16>
    %cst_9 = arith.constant dense<0.000000e+00> : vector<16x25xf32>
    %10 = tpu.matmul %1, %9, %cst_9 {dimension_numbers = #tpu.dot_dimension_numbers<[1], [0], [0], [1], [0, 0, 1, 1], [], []>} : vector<16x32xbf16>, vector<32x25xbf16>, vector<16x25xf32> -> vector<16x25xf32>
    %cst_10 = arith.constant 6.250000e-02 : f32
    %11 = vector.broadcast %cst_10 : f32 to vector<16x25xf32>
    %12 = arith.mulf %10, %11 : vector<16x25xf32>
    %13 = vector.broadcast %3 : vector<16x1xf32> to vector<16x25xf32>
    %14 = arith.addf %12, %13 : vector<16x25xf32>
    %cst_11 = arith.constant dense<0xFF800000> : vector<25xf32>
    %15 = vector.multi_reduction <maximumf>, %14, %cst_11 [0] : vector<16x25xf32> to vector<25xf32>
    %16 = vector.shape_cast %15 : vector<25xf32> to vector<1x25xf32>
    %17 = vector.broadcast %16 : vector<1x25xf32> to vector<16x25xf32>
    %18 = arith.subf %14, %17 : vector<16x25xf32>
    %19 = math.exp %18 : vector<16x25xf32>
    %cst_12 = arith.constant dense<0.000000e+00> : vector<25xf32>
    %20 = vector.multi_reduction <add>, %19, %cst_12 [0] : vector<16x25xf32> to vector<25xf32>
    %21 = vector.shape_cast %20 : vector<25xf32> to vector<1x25xf32>
    %22 = tpu.reciprocal %21 {approx = true} : vector<1x25xf32> -> vector<1x25xf32>
    %23 = vector.broadcast %22 : vector<1x25xf32> to vector<16x25xf32>
    %24 = arith.mulf %19, %23 : vector<16x25xf32>
    %cst_13 = arith.constant dense<0.000000e+00> : vector<1x16xf32>
    %25 = tpu.matmul %4, %24, %cst_13 {dimension_numbers = #tpu.dot_dimension_numbers<[1], [1], [0], [0], [0, 0, 1, 0], [], []>} : vector<1x25xf32>, vector<16x25xf32>, vector<1x16xf32> -> vector<1x16xf32>
    %c0_14 = arith.constant 0 : index
    %c0_15 = arith.constant 0 : index
    %26 = vector.load %arg5[%c0_14, %c0_15] : memref<2x16xf32, #tpu.memory_space<vmem>>, vector<1x16xf32>
    tpu.vector_store %arg5[%c0_14, %c0_15], %25 {strides = array<i32>} : memref<2x16xf32, #tpu.memory_space<vmem>>, vector<1x16xf32>,
    %c1 = arith.constant 1 : index
    %c0_16 = arith.constant 0 : index
    %c0_17 = arith.constant 0 : index
    %27 = vector.load %arg1[%c1, %c0_16, %c0_17] : memref<2x32x64xf32, #tpu.memory_space<vmem>>, vector<1x32x64xf32>
    %28 = vector.shape_cast %27 : vector<1x32x64xf32> to vector<32x64xf32>
    %29 = arith.truncf %28 : vector<32x64xf32> to vector<32x64xbf16>
    %cst_18 = arith.constant dense<0.000000e+00> : vector<32x25xf32>
    %30 = tpu.matmul %29, %2, %cst_18 {dimension_numbers = #tpu.dot_dimension_numbers<[1], [0], [0], [1], [0, 0, 1, 1], [], []>} : vector<32x64xbf16>, vector<64x25xbf16>, vector<32x25xf32> -> vector<32x25xf32>
    %31 = arith.truncf %30 : vector<32x25xf32> to vector<32x25xbf16>
    %cst_19 = arith.constant dense<0.000000e+00> : vector<16x25xf32>
    %32 = tpu.matmul %1, %31, %cst_19 {dimension_numbers = #tpu.dot_dimension_numbers<[1], [0], [0], [1], [0, 0, 1, 1], [], []>} : vector<16x32xbf16>, vector<32x25xbf16>, vector<16x25xf32> -> vector<16x25xf32>
    %cst_20 = arith.constant 6.250000e-02 : f32
    %33 = vector.broadcast %cst_20 : f32 to vector<16x25xf32>
    %34 = arith.mulf %32, %33 : vector<16x25xf32>
    %35 = vector.broadcast %3 : vector<16x1xf32> to vector<16x25xf32>
    %36 = arith.addf %34, %35 : vector<16x25xf32>
    %cst_21 = arith.constant dense<0xFF800000> : vector<25xf32>
    %37 = vector.multi_reduction <maximumf>, %36, %cst_21 [0] : vector<16x25xf32> to vector<25xf32>
    %38 = vector.shape_cast %37 : vector<25xf32> to vector<1x25xf32>
    %39 = vector.broadcast %38 : vector<1x25xf32> to vector<16x25xf32>
    %40 = arith.subf %36, %39 : vector<16x25xf32>
    %41 = math.exp %40 : vector<16x25xf32>
    %cst_22 = arith.constant dense<0.000000e+00> : vector<25xf32>
    %42 = vector.multi_reduction <add>, %41, %cst_22 [0] : vector<16x25xf32> to vector<25xf32>
    %43 = vector.shape_cast %42 : vector<25xf32> to vector<1x25xf32>
    %44 = tpu.reciprocal %43 {approx = true} : vector<1x25xf32> -> vector<1x25xf32>
    %45 = vector.broadcast %44 : vector<1x25xf32> to vector<16x25xf32>
    %46 = arith.mulf %41, %45 : vector<16x25xf32>
    %cst_23 = arith.constant dense<0.000000e+00> : vector<1x16xf32>
    %47 = tpu.matmul %4, %46, %cst_23 {dimension_numbers = #tpu.dot_dimension_numbers<[1], [1], [0], [0], [0, 0, 1, 0], [], []>} : vector<1x25xf32>, vector<16x25xf32>, vector<1x16xf32> -> vector<1x16xf32>
    %c1_24 = arith.constant 1 : index
    %c0_25 = arith.constant 0 : index
    %48 = vector.load %arg5[%c1_24, %c0_25] : memref<2x16xf32, #tpu.memory_space<vmem>>, vector<1x16xf32>
    tpu.vector_store %arg5[%c1_24, %c0_25], %47 {strides = array<i32>} : memref<2x16xf32, #tpu.memory_space<vmem>>, vector<1x16xf32>,
    return
  }
  func.func @transform_0(%arg0: i32) -> (i32, i32, i32) {
    %c0_i32 = arith.constant 0 : i32
    %c0_i32_0 = arith.constant 0 : i32
    %c0_i32_1 = arith.constant 0 : i32
    return %arg0, %c0_i32, %c0_i32_0 : i32, i32, i32
  }
  func.func @transform_1(%arg0: i32) -> (i32, i32) {
    %c0_i32 = arith.constant 0 : i32
    %c0_i32_0 = arith.constant 0 : i32
    %c0_i32_1 = arith.constant 0 : i32
    return %c0_i32, %c0_i32_0 : i32, i32
  }
  func.func @transform_2(%arg0: i32) -> (i32, i32) {
    %c0_i32 = arith.constant 0 : i32
    %c0_i32_0 = arith.constant 0 : i32
    %c0_i32_1 = arith.constant 0 : i32
    return %c0_i32, %c0_i32_0 : i32, i32
  }
  func.func @transform_3(%arg0: i32) -> (i32, i32) {
    %c0_i32 = arith.constant 0 : i32
    %c0_i32_0 = arith.constant 0 : i32
    %c0_i32_1 = arith.constant 0 : i32
    return %c0_i32, %c0_i32_0 : i32, i32
  }
  func.func @transform_4(%arg0: i32) -> (i32, i32) {
    %c0_i32 = arith.constant 0 : i32
    %c0_i32_0 = arith.constant 0 : i32
    return %arg0, %c0_i32 : i32, i32
  }
}

</mosaic_0001>

<bundles_post_ra>
// kernel: tpu_custom_call.1
= control target key start
LH: loop header
LB: loop body
LE: loop exit
PB: predicated region body
PF: predicated region fallthrough
CT: control target
= control target key end

     0   :  { %9 = vsyncpa [#allocation3], 0  ;;  %s828_s0 = inlined_call_operand.vmem [shape: f32[2,32,64], index: 0, kind: input, shape index: {}]   ;;  %s829_s1 = inlined_call_operand.hbm [shape: f32[16,32], index: 1, kind: input, shape index: {}]   ;;  %s830_s2 = inlined_call_operand.vmem [shape: bf16[64,25], index: 2, kind: input, shape index: {}]   ;;  %s831_s3 = inlined_call_operand.vmem [shape: f32[16,1], index: 3, kind: input, shape index: {}]   ;;  %s832_s4 = inlined_call_operand.hbm [shape: f32[2,16], index: 4, kind: output, shape index: {}]  }
   0x1   :  { %10 = vsyncpa [#allocation4], 0  ;;  %s697_s15 = smov [#allocation2]  }
   0x2   :  { %s18_s16 = sshll.u32 %s697_s15, 4  ;;  %s19_s16 = int_to_ptr.vmem [resolvable:$true] %s18_s16 }
   0x3   :  { %s661_s17 = scalar_lea.vmem %s19_s16, 256  ;;  %p666_p1 = scmp.lt.s32.totalorder %s19_s16, %s19_s16 }
   0x4   :  { %p662_p0 = scmp.ne.s32.totalorder %s19_s16, %s661_s17  ;;  %p667_p2 = scmp.lt.s32.totalorder %s661_s17, %s661_s17 }
   0x6   :  { %p668_p3 = por %p667_p2, %p666_p1 }
   0x8   :  { %p669_p4 = pnand %p668_p3, %p662_p0 }
   0xa   :  { %672 = shalt.err (!%p669_p4)
}
   0xb   :  { %s698_s18 = smov 128   ;;  %s699_s19 = smov 8  }
   0xc   :  { %24 = dma.hbm_to_vmem [thread:$0]  %s829_s1, 256, %s19_s16, [#allocation3], %s698_s18, %s698_s18, %s699_s19  }
   0xd   :  { %693 = dma.done.wait [#allocation3], 256  }
   0xe   :  { %694 = vsyncadd [#allocation3], 4294967040  ;;  %v637_v0 = vld [vmem:[%s830_s2 + $0x18] sm:$0xff]   ;;  %v638_v1 = vld [vmem:[%s830_s2 + $0x10] sm:$0xff]   ;;  %vm76_vm0 = vcmask 523264   ;;  %v700_v10 = vmov 0.0  }
   0xf   :  { %574 = vmatprep.subr.bf16.mxu0 %v637_v0  ;;  %v639_v2 = vld [vmem:[%s830_s2 + $0x8] sm:$0xff]   ;;  %v46_v3 = vld [vmem:[%s828_s0] sm:$0xff]  ;;  %v48_v7 = vld [vmem:[%s828_s0 + $0x10] sm:$0xff]  ;;  %586 = vmatprep.subr.bf16.mxu1 %v700_v10  ;;  %vm701_vm1 = vmmov 0   ;;  %v702_v14 = vmov 0   ;;  %vm134_vm2 = vcmask 261120  }
  0x10   :  { %575 = vmatpush3.bf16.msra.mxu0 %v637_v0  ;;  %v47_v4 = vld [vmem:[%s828_s0 + $0x8] sm:$0xff]  ;;  %v640_v6 = vld [vmem:[%s830_s2] sm:$0xff]   ;;  %v49_v8 = vld [vmem:[%s828_s0 + $0x18] sm:$0xff]  ;;  %590 = vmatprep.mubr.msk.bf16.mxu1 %vm701_vm1, %v700_v10  ;;  %vm193_vm3 = vcmask 203776   ;;  %vm300_vm4 = vcmask 122880  }
  0x11   :  { %576 = vmatprep.subr.bf16.mxu0 %v638_v1  ;;  %v50_v5 = vpack.c.bf16 %v47_v4, %v46_v3  ;;  %v51_v9 = vpack.c.bf16 %v49_v8, %v48_v7  ;;  %v44_v11 = vld [vmem:[%s831_s3] sm:$0xff]  ;;  %v541_v13 = vld [vmem:[%s828_s0 + $0x28] sm:$0xff]  ;;  %636 = vset.pattern.permute.xlu0 %v702_v14  ;;  %v542_v16 = vld [vmem:[%s828_s0 + $0x30] sm:$0xff]  ;;  %v703_v7 = vmov 0.04  }
  0x12   :  { %v540_v12 = vld [vmem:[%s828_s0 + $0x20] sm:$0xff]  ;;  %v543_v17 = vld [vmem:[%s828_s0 + $0x38] sm:$0xff]  ;;  %183 = vperm.xlu0 %636, %v44_v11   ;;  %v45_v19 = vld [vmem:[%s831_s3 + $0x8] sm:$0xff]  ;;  %s704_s0 = smov [#allocation5]  }
  0x13   :  { %582 = vmatprep.mubr.msk.bf16.mxu0 %vm76_vm0, %v50_v5  ;;  %v307_v15 = vpack.c.bf16 %v541_v13, %v540_v12  ;;  %v308_v18 = vpack.c.bf16 %v543_v17, %v542_v16  ;;  %v33_v25 = vld [vmem:[#allocation2] sm:$0xff]  ;;  %v34_v26 = vld [vmem:[#allocation2 + $0x8] sm:$0xff]  ;;  %s521_s3 = sshll.u32 %s704_s0, 4  ;;  %s522_s3 = int_to_ptr.vmem [resolvable:$true] %s521_s3 }
  0x14   :  { %577 = vmatpush3.bf16.msra.mxu0 %v638_v1  ;;  %v783_v28 = vpack.c.bf16 %v34_v26, %v33_v25  ;;  %s673_s22 = scalar_lea.vmem %s522_s3, 32  ;;  %p678_p6 = scmp.lt.s32.totalorder %s522_s3, %s522_s3 }
  0x15   :  { %578 = vmatprep.subr.bf16.mxu0 %v639_v2  ;;  %p674_p5 = scmp.ne.s32.totalorder %s522_s3, %s673_s22  ;;  %p679_p7 = scmp.lt.s32.totalorder %s673_s22, %s673_s22 }
  0x16   :  { %188 = vperm.xlu0 %636, %v45_v19  }
  0x17   :  { %p680_p8 = por %p679_p7, %p678_p6 }
  0x18   :  { %579 = vmatpush3.bf16.msra.mxu0 %v639_v2 }
  0x19   :  { %580 = vmatprep.subr.bf16.mxu0 %v640_v6  ;;  %p681_p9 = pnand %p680_p8, %p674_p5 }
  0x1c   :  { %581 = vmatpush3.bf16.msra.mxu0 %v640_v6 }
  0x1d   :  { %601 = vmatprep.subr.bf16.mxu0 %v637_v0 }
  0x1f   :  { %583 = vmatmul.mubr.msk.bf16.vlgmr.msra.gmra.mxu0 %vm76_vm0, %v51_v9 }
  0x20   :  { %602 = vmatpush3.bf16.msra.mxu0 %v637_v0  ;;  %609 = vmatprep.mubr.msk.bf16.mxu0 %vm76_vm0, %v307_v15 }
  0x21   :  { %603 = vmatprep.subr.bf16.mxu0 %v638_v1 }
  0x24   :  { %604 = vmatpush3.bf16.msra.mxu0 %v638_v1 }
  0x25   :  { %605 = vmatprep.subr.bf16.mxu0 %v639_v2 }
  0x28   :  { %606 = vmatpush3.bf16.msra.mxu0 %v639_v2 }
  0x29   :  { %607 = vmatprep.subr.bf16.mxu0 %v640_v6 }
  0x2c   :  { %608 = vmatpush3.bf16.msra.mxu0 %v640_v6 }
  0x2f   :  { %610 = vmatmul.mubr.msk.bf16.vlgmr.msra.gmra.mxu0 %vm76_vm0, %v308_v18 }
  0x8d   :  { %v790_v29 = vpop.permute.xlu0 %183 }
  0x91   :  { %v793_v36 = vpop.permute.xlu0 %188 }
  0xdf   :  { %v584_v20 = vpop.f32.mrf.mxu0 }
  0xe1   :  { %v117_v21 = vpop.f32.mrf.mxu0 }
  0xe3   :  { %v585_v22 = vpop.f32.mrf.mxu0 }
  0xe4   :  { %v133_v23 = vpack.c.bf16 %v585_v22, %v584_v20 }
  0xe5   :  { %v120_v24 = vpop.f32.mrf.mxu0 }
  0xe6   :  { %587 = vmatpush3.bf16.msra.mxu1 %v133_v23  ;;  %v132_v27 = vpack.c.bf16 %v120_v24, %v117_v21 }
  0xe7   :  { %588 = vmatprep.subr.bf16.mxu1 %v700_v10 }
  0xea   :  { %589 = vmatpush3.bf16.msra.mxu1 %v132_v27 }
  0xeb   :  { %594 = vmatprep.subr.mxu1 %v700_v10 }
  0xed   :  { %591 = vmatmul.mubr.msk.bf16.vlgmr.msra.gmra.mxu1 %vm134_vm2, %v783_v28 }
  0xee   :  { %598 = vmatprep.mubr.msk.f32.mxu1 %vm701_vm1, %v700_v10 }
  0xef   :  { %v611_v63 = vpop.f32.mrf.mxu0 }
  0xf1   :  { %v349_v2 = vpop.f32.mrf.mxu0 }
  0xf3   :  { %v612_v4 = vpop.f32.mrf.mxu0 }
  0xf4   :  { %v365_v5 = vpack.c.bf16 %v612_v4, %v611_v63 }
  0xf5   :  { %v352_v6 = vpop.f32.mrf.mxu0 }
  0xf6   :  { %v364_v8 = vpack.c.bf16 %v352_v6, %v349_v2 }
 0x1ad   :  { %v172_v30 = vpop.f32.mrf.mxu1 }
 0x1ae   :  { %v179_v31 = vmul.f32 0.0625, %v172_v30 }
 0x1af   :  { %v592_v32 = vpop.f32.mrf.mxu1 }
 0x1b0   :  { %v191_v34 = vadd.f32 %v790_v29, %v179_v31 }
 0x1b1   :  { %v175_v33 = vpop.f32.mrf.mxu1 }
 0x1b2   :  { %v180_v35 = vmul.f32 0.0625, %v175_v33  ;;  %v194_v39 = vsel %vm193_vm3, %v191_v34, -inf }
 0x1b3   :  { %v593_v37 = vpop.f32.mrf.mxu1 }
 0x1b4   :  { %v192_v38 = vadd.f32 %v793_v36, %v180_v35 }
 0x1b6   :  { %v195_v40 = vsel %vm193_vm3, %v192_v38, -inf }
 0x1b7   :  { %v196_v41 = vmax.f32 %v194_v39, %v195_v40 }
 0x1b9   :  { %v197_v42 = vrot.slane %v196_v41, 4 }
 0x1bb   :  { %v198_v43 = vmax.f32 %v196_v41, %v197_v42 }
 0x1bd   :  { %v199_v44 = vrot.slane %v198_v43, 2 }
 0x1bf   :  { %v200_v45 = vmax.f32 %v198_v43, %v199_v44 }
 0x1c1   :  { %v201_v46 = vrot.slane %v200_v45, 1 }
 0x1c3   :  { %v202_v47 = vmax.f32 %v200_v45, %v201_v46 }
 0x1c5   :  { %v203_v48 = vsub.f32 %v191_v34, %v202_v47  ;;  %v204_v49 = vsub.f32 %v192_v38, %v202_v47 }
 0x1c7   :  { %v205_v50 = vmul.f32 1.442695, %v203_v48  ;;  %v207_v51 = vmul.f32 1.442695, %v204_v49 }
 0x1c9   :  { %641 = vpow2.f32 %v205_v50 }
 0x1ca   :  { %643 = vpow2.f32 %v207_v51 }
 0x1d6   :  { %v642_v52 = vpop.eup %641 }
 0x1d7   :  { %v644_v53 = vpop.eup %643  ;;  %v209_v54 = vsel %vm193_vm3, %v642_v52, 0.0 }
 0x1d8   :  { %v210_v55 = vsel %vm193_vm3, %v644_v53, 0.0 }
 0x1d9   :  { %v211_v56 = vadd.f32 %v210_v55, %v209_v54 }
 0x1db   :  { %v212_v57 = vrot.slane %v211_v56, 4 }
 0x1dd   :  { %v213_v58 = vadd.f32 %v212_v57, %v211_v56 }
 0x1df   :  { %v214_v59 = vrot.slane %v213_v58, 2 }
 0x1e1   :  { %v215_v60 = vadd.f32 %v214_v59, %v213_v58 }
 0x1e3   :  { %v216_v61 = vrot.slane %v215_v60, 1 }
 0x1e5   :  { %v217_v62 = vadd.f32 %v216_v61, %v215_v60 }
 0x1e7   :  { %645 = vrcp.f32 %v217_v62 }
 0x1f4   :  { %v646_v0 = vpop.eup %645 }
 0x1f5   :  { %v220_v1 = vmul.f32 %v646_v0, %v644_v53  ;;  %v219_v3 = vmul.f32 %v646_v0, %v642_v52 }
 0x1f7   :  { %595 = vmatpush3.xpose.msk.msra.mxu1 %vm193_vm3, %v220_v1 }
 0x1f8   :  { %596 = vmatprep.subr.mxu1 %v700_v10 }
 0x1fb   :  { %597 = vmatpush3.xpose.msk.msra.mxu1 %vm193_vm3, %v219_v3 }
 0x1fc   :  { %613 = vmatprep.subr.bf16.mxu1 %v700_v10 }
 0x1fe   :  { %599 = vmatmul.mubr.msk.f32.vlgmr.msra.gmra.mxu1 %vm193_vm3, %v703_v7 }
 0x1ff   :  { %614 = vmatpush3.bf16.msra.mxu1 %v365_v5  ;;  %617 = vmatprep.mubr.msk.bf16.mxu1 %vm701_vm1, %v700_v10 }
 0x200   :  { %615 = vmatprep.subr.bf16.mxu1 %v700_v10 }
 0x203   :  { %616 = vmatpush3.bf16.msra.mxu1 %v364_v8 }
 0x204   :  { %621 = vmatprep.subr.mxu1 %v700_v10 }
 0x206   :  { %618 = vmatmul.mubr.msk.bf16.vlgmr.msra.gmra.mxu1 %vm134_vm2, %v783_v28 }
 0x207   :  { %625 = vmatprep.mubr.msk.f32.mxu1 %vm701_vm1, %v700_v10 }
 0x2be   :  { %v296_v9 = vpop.f32.mrf.mxu1 }
 0x2bf   :  { %301 = vst.msk [vmem:[#allocation5] sm:$0x1] %vm300_vm4, %v296_v9 }
 0x2c0   :  { %v600_v11 = vpop.f32.mrf.mxu1 }
 0x2c6   :  { %v400_v12 = vpop.f32.mrf.mxu1 }
 0x2c7   :  { %v407_v13 = vmul.f32 0.0625, %v400_v12 }
 0x2c8   :  { %v619_v14 = vpop.f32.mrf.mxu1 }
 0x2c9   :  { %v409_v16 = vadd.f32 %v407_v13, %v790_v29 }
 0x2ca   :  { %v403_v15 = vpop.f32.mrf.mxu1 }
 0x2cb   :  { %v408_v17 = vmul.f32 0.0625, %v403_v15  ;;  %v411_v20 = vsel %vm193_vm3, %v409_v16, -inf }
 0x2cc   :  { %v620_v18 = vpop.f32.mrf.mxu1 }
 0x2cd   :  { %v410_v19 = vadd.f32 %v408_v17, %v793_v36 }
 0x2cf   :  { %v412_v21 = vsel %vm193_vm3, %v410_v19, -inf }
 0x2d0   :  { %v413_v22 = vmax.f32 %v411_v20, %v412_v21 }
 0x2d2   :  { %v414_v23 = vrot.slane %v413_v22, 4 }
 0x2d4   :  { %v415_v24 = vmax.f32 %v413_v22, %v414_v23 }
 0x2d6   :  { %v416_v25 = vrot.slane %v415_v24, 2 }
 0x2d8   :  { %v417_v26 = vmax.f32 %v415_v24, %v416_v25 }
 0x2da   :  { %v418_v27 = vrot.slane %v417_v26, 1 }
 0x2dc   :  { %v419_v28 = vmax.f32 %v417_v26, %v418_v27 }
 0x2de   :  { %v420_v30 = vsub.f32 %v409_v16, %v419_v28  ;;  %v421_v31 = vsub.f32 %v410_v19, %v419_v28 }
 0x2e0   :  { %v422_v32 = vmul.f32 1.442695, %v420_v30  ;;  %v424_v33 = vmul.f32 1.442695, %v421_v31 }
 0x2e2   :  { %647 = vpow2.f32 %v422_v32 }
 0x2e3   :  { %649 = vpow2.f32 %v424_v33 }
 0x2ef   :  { %v648_v29 = vpop.eup %647 }
 0x2f0   :  { %v650_v34 = vpop.eup %649  ;;  %v426_v35 = vsel %vm193_vm3, %v648_v29, 0.0 }
 0x2f1   :  { %v427_v36 = vsel %vm193_vm3, %v650_v34, 0.0 }
 0x2f2   :  { %v428_v37 = vadd.f32 %v427_v36, %v426_v35 }
 0x2f4   :  { %v429_v38 = vrot.slane %v428_v37, 4 }
 0x2f6   :  { %v430_v39 = vadd.f32 %v429_v38, %v428_v37 }
 0x2f8   :  { %v431_v40 = vrot.slane %v430_v39, 2 }
 0x2fa   :  { %v432_v41 = vadd.f32 %v431_v40, %v430_v39 }
 0x2fc   :  { %v433_v42 = vrot.slane %v432_v41, 1 }
 0x2fe   :  { %v434_v43 = vadd.f32 %v433_v42, %v432_v41 }
 0x300   :  { %651 = vrcp.f32 %v434_v43 }
 0x30d   :  { %v652_v44 = vpop.eup %651 }
 0x30e   :  { %v437_v45 = vmul.f32 %v652_v44, %v650_v34  ;;  %v436_v46 = vmul.f32 %v652_v44, %v648_v29 }
 0x310   :  { %622 = vmatpush3.xpose.msk.msra.mxu1 %vm193_vm3, %v437_v45 }
 0x311   :  { %623 = vmatprep.subr.mxu1 %v700_v10 }
 0x314   :  { %624 = vmatpush3.xpose.msk.msra.mxu1 %vm193_vm3, %v436_v46 }
 0x317   :  { %626 = vmatmul.mubr.msk.f32.vlgmr.msra.gmra.mxu1 %vm193_vm3, %v703_v7 }
 0x3d7   :  { %v510_v47 = vpop.f32.mrf.mxu1 }
 0x3d8   :  { %514 = vst.msk [vmem:[#allocation5 + $0x1] sm:$0x1] %vm300_vm4, %v510_v47 }
 0x3d9   :  { %v627_v48 = vpop.f32.mrf.mxu1 }
 0x3da   :  { %684 = shalt.err (!%p681_p9)
}
 0x3db   :  { %524 = dma.vmem_to_hbm [thread:$0]  %s522_s3, 32, %s832_s4, [#allocation4]  }
 0x3dc   :  { %695 = dma.done.wait [#allocation4], 32  }
 0x3dd   :  { %696 = vsyncadd [#allocation4], 4294967264 }
 0x3de   :  { %528 = vsyncpa [#allocation3], 1 }
 0x3df   :  { %529 = vsyncpa [#allocation4], 1 }

</bundles_post_ra>
